<compile_context>
chip_gen: v6e
topology: v6e:2x2x1
jax: 0.10.0
libtpu: 0.0.40
codegen_flags: <defaults>
</compile_context>

<pallas_src>
import jax
import jax.numpy as jnp
from jax.experimental import pallas as pl
from jax.experimental.pallas import tpu as pltpu


def _round_up(x, m):
    return ((x + m - 1) // m) * m


def conv1x1_kernel(x_ref, w_ref, b_ref, o_ref):
    # x_ref: (C_in, TILE)   w_ref: (C_out, C_in)   b_ref: (C_out, 1)
    # o_ref: (C_out, TILE)
    c_out, c_in = w_ref.shape
    tile = x_ref.shape[1]

    x = x_ref[...].astype(jnp.float32)          # (C_in, TILE)
    w = w_ref[...].astype(jnp.float32)          # (C_out, C_in)

    # Fold bias into the accumulator init (f32 accumulation throughout).
    acc = jnp.broadcast_to(b_ref[...].astype(jnp.float32), (c_out, tile))

    # Unrolled K-reduction on the VPU: C_in broadcast FMAs over a
    # lane-dense (C_out, TILE) tile. No MXU round-trip for tiny channels.
    for c in range(c_in):
        acc = acc + w[:, c:c + 1] * x[c:c + 1, :]

    o_ref[...] = acc.astype(o_ref.dtype)


def simple_cnn_forward(x, w, b, *, max_tile_l=2048):
    """x: (N, C_in, L) f32, w: (C_out, C_in) f32, b: (C_out,) f32 -> (N, C_out, L)."""
    n, c_in, length = x.shape
    c_out = w.shape[0]
    nl = n * length

    # Collapse batch into the lane axis: (N, C_in, L) -> (C_in, N*L).
    xt = jnp.transpose(x, (1, 0, 2)).reshape(c_in, nl)

    # Lane tile: multiple of 128, capped (VMEM headroom on v7x), covering N*L.
    tile = min(max_tile_l, _round_up(nl, 128))
    tile = _round_up(tile, 128)
    lp = _round_up(nl, tile)
    if lp != nl:
        xt = jnp.pad(xt, ((0, 0), (0, lp - nl)))
    num_tiles = lp // tile

    b2d = b.reshape(c_out, 1)

    out_padded = pl.pallas_call(
        conv1x1_kernel,
        out_shape=jax.ShapeDtypeStruct((c_out, lp), x.dtype),
        grid_spec=pltpu.PrefetchScalarGridSpec(
            num_scalar_prefetch=0,
            grid=(num_tiles,),
            in_specs=[
                pl.BlockSpec((c_in, tile), lambda i: (0, i)),
                pl.BlockSpec((c_out, c_in), lambda i: (0, 0)),
                pl.BlockSpec((c_out, 1), lambda i: (0, 0)),
            ],
            out_specs=pl.BlockSpec((c_out, tile), lambda i: (0, i)),
        ),
        compiler_params=pltpu.CompilerParams(
            dimension_semantics=("parallel",)),
    )(xt, w, b2d)

    # Strip lane padding and restore PyTorch NCL layout.
    out = out_padded[:, :nl].reshape(c_out, n, length)
    return jnp.transpose(out, (1, 0, 2))


def reference_forward(x, w, b):
    # Pure-JAX reference of nn.Conv1d(kernel_size=1).
    return jnp.einsum("oc,ncl->nol", w, x) + b[None, :, None]


if __name__ == "__main__":
    # Module hyperparameters (shapes implied by SimpleCNN.__init__).
    input_features = 4    # C_in
    output_classes = 8    # C_out
    batch = 2
    length = 16

    key = jax.random.PRNGKey(0)
    kx, kw, kb = jax.random.split(key, 3)

    # Deterministic synthetic parameters (PyTorch-like uniform fan-in scale).
    bound = 1.0 / (input_features ** 0.5)
    w = jax.random.uniform(kw, (output_classes, input_features),
                           jnp.float32, -bound, bound)
    b = jax.random.uniform(kb, (output_classes,), jnp.float32, -bound, bound)

    x = jax.random.normal(kx, (batch, input_features, length), jnp.float32)

    out = simple_cnn_forward(x, w, b)
    out = jax.block_until_ready(out)

    ref = reference_forward(x, w, b)
    assert out.shape == (batch, output_classes, length)
    assert jnp.allclose(out, ref, atol=1e-5, rtol=1e-5)

    print("KERNEL_OK")
</pallas_src>

<mosaic_0001>
module attributes {stable_mosaic.version = 11 : i64} {
  func.func @conv1x1_kernel(%arg0: i32, %arg1: memref<4x128xf32, #tpu.memory_space<vmem>>, %arg2: memref<8x4xf32, #tpu.memory_space<vmem>>, %arg3: memref<8x1xf32, #tpu.memory_space<vmem>>, %arg4: memref<8x128xf32, #tpu.memory_space<vmem>>) attributes {dimension_semantics = [#tpu.dimension_semantics<parallel>], iteration_bounds = array<i64: 1>, scalar_prefetch = 0 : i64, scratch_operands = 0 : i64, tpu.core_type = #tpu.core_type<tc>, window_params = [{transform_indices = @transform_0, window_bounds = array<i64: 4, 128>}, {pipeline_mode = #tpu.pipeline_mode<synchronous>, transform_indices = @transform_1, window_bounds = array<i64: 8, 4>}, {pipeline_mode = #tpu.pipeline_mode<synchronous>, transform_indices = @transform_2, window_bounds = array<i64: 8, 1>}, {transform_indices = @transform_3, window_bounds = array<i64: 8, 128>}]} {
    %c0 = arith.constant 0 : index
    %c0_0 = arith.constant 0 : index
    %0 = vector.load %arg1[%c0, %c0_0] : memref<4x128xf32, #tpu.memory_space<vmem>>, vector<4x128xf32>
    %c0_1 = arith.constant 0 : index
    %c0_2 = arith.constant 0 : index
    %1 = vector.load %arg2[%c0_1, %c0_2] : memref<8x4xf32, #tpu.memory_space<vmem>>, vector<8x4xf32>
    %c0_3 = arith.constant 0 : index
    %c0_4 = arith.constant 0 : index
    %2 = vector.load %arg3[%c0_3, %c0_4] : memref<8x1xf32, #tpu.memory_space<vmem>>, vector<8x1xf32>
    %3 = vector.shape_cast %2 : vector<8x1xf32> to vector<8x1xf32>
    %4 = vector.broadcast %3 : vector<8x1xf32> to vector<8x128xf32>
    %5 = vector.extract_strided_slice %1 {offsets = [0, 0], sizes = [8, 1], strides = [1, 1]} : vector<8x4xf32> to vector<8x1xf32>
    %6 = vector.extract_strided_slice %0 {offsets = [0, 0], sizes = [1, 128], strides = [1, 1]} : vector<4x128xf32> to vector<1x128xf32>
    %7 = vector.broadcast %5 : vector<8x1xf32> to vector<8x128xf32>
    %8 = vector.broadcast %6 : vector<1x128xf32> to vector<8x128xf32>
    %9 = arith.mulf %7, %8 : vector<8x128xf32>
    %10 = arith.addf %4, %9 : vector<8x128xf32>
    %11 = vector.extract_strided_slice %1 {offsets = [0, 1], sizes = [8, 1], strides = [1, 1]} : vector<8x4xf32> to vector<8x1xf32>
    %12 = vector.extract_strided_slice %0 {offsets = [1, 0], sizes = [1, 128], strides = [1, 1]} : vector<4x128xf32> to vector<1x128xf32>
    %13 = vector.broadcast %11 : vector<8x1xf32> to vector<8x128xf32>
    %14 = vector.broadcast %12 : vector<1x128xf32> to vector<8x128xf32>
    %15 = arith.mulf %13, %14 : vector<8x128xf32>
    %16 = arith.addf %10, %15 : vector<8x128xf32>
    %17 = vector.extract_strided_slice %1 {offsets = [0, 2], sizes = [8, 1], strides = [1, 1]} : vector<8x4xf32> to vector<8x1xf32>
    %18 = vector.extract_strided_slice %0 {offsets = [2, 0], sizes = [1, 128], strides = [1, 1]} : vector<4x128xf32> to vector<1x128xf32>
    %19 = vector.broadcast %17 : vector<8x1xf32> to vector<8x128xf32>
    %20 = vector.broadcast %18 : vector<1x128xf32> to vector<8x128xf32>
    %21 = arith.mulf %19, %20 : vector<8x128xf32>
    %22 = arith.addf %16, %21 : vector<8x128xf32>
    %23 = vector.extract_strided_slice %1 {offsets = [0, 3], sizes = [8, 1], strides = [1, 1]} : vector<8x4xf32> to vector<8x1xf32>
    %24 = vector.extract_strided_slice %0 {offsets = [3, 0], sizes = [1, 128], strides = [1, 1]} : vector<4x128xf32> to vector<1x128xf32>
    %25 = vector.broadcast %23 : vector<8x1xf32> to vector<8x128xf32>
    %26 = vector.broadcast %24 : vector<1x128xf32> to vector<8x128xf32>
    %27 = arith.mulf %25, %26 : vector<8x128xf32>
    %28 = arith.addf %22, %27 : vector<8x128xf32>
    %c0_5 = arith.constant 0 : index
    %c0_6 = arith.constant 0 : index
    %29 = vector.load %arg4[%c0_5, %c0_6] : memref<8x128xf32, #tpu.memory_space<vmem>>, vector<8x128xf32>
    tpu.vector_store %arg4[%c0_5, %c0_6], %28 {strides = array<i32>} : memref<8x128xf32, #tpu.memory_space<vmem>>, vector<8x128xf32>,
    return
  }
  func.func @transform_0(%arg0: i32) -> (i32, i32) {
    %c0_i32 = arith.constant 0 : i32
    %c0_i32_0 = arith.constant 0 : i32
    return %c0_i32, %arg0 : i32, i32
  }
  func.func @transform_1(%arg0: i32) -> (i32, i32) {
    %c0_i32 = arith.constant 0 : i32
    %c0_i32_0 = arith.constant 0 : i32
    %c0_i32_1 = arith.constant 0 : i32
    return %c0_i32, %c0_i32_0 : i32, i32
  }
  func.func @transform_2(%arg0: i32) -> (i32, i32) {
    %c0_i32 = arith.constant 0 : i32
    %c0_i32_0 = arith.constant 0 : i32
    %c0_i32_1 = arith.constant 0 : i32
    return %c0_i32, %c0_i32_0 : i32, i32
  }
  func.func @transform_3(%arg0: i32) -> (i32, i32) {
    %c0_i32 = arith.constant 0 : i32
    %c0_i32_0 = arith.constant 0 : i32
    return %c0_i32, %arg0 : i32, i32
  }
}

</mosaic_0001>

<bundles_post_ra>
// kernel: tpu_custom_call.1
= control target key start
LH: loop header
LB: loop body
LE: loop exit
PB: predicated region body
PF: predicated region fallthrough
CT: control target
= control target key end

     0   :  { %v110_v1 = vmov 0   ;;  %v111_v2 = vmov 1   ;;  %s147_s0 = inlined_call_operand.vmem [shape: f32[4,128], index: 0, kind: input, shape index: {}]   ;;  %s148_s1 = inlined_call_operand.vmem [shape: f32[8,4], index: 1, kind: input, shape index: {}]   ;;  %s149_s2 = inlined_call_operand.vmem [shape: f32[8,1], index: 2, kind: input, shape index: {}]   ;;  %s150_s3 = inlined_call_operand.hbm [shape: f32[8,128], index: 3, kind: output, shape index: {}]  }
   0x1   :  { %v16_v0 = vld [vmem:[%s148_s1] sm:$0xff]  ;;  %84 = vset.pattern.permute.xlu0 %v110_v1  ;;  %85 = vset.pattern.permute.xlu1 %v111_v2 }
   0x2   :  { %8 = vsyncpa [#allocation3], 0  ;;  %25 = vperm.xlu0 %84, %v16_v0   ;;  %35 = vperm.xlu1 %85, %v16_v0   ;;  %v17_v3 = vld [vmem:[%s149_s2] sm:$0xff]  ;;  %v112_v4 = vmov 2   ;;  %v113_v5 = vmov 3   ;;  %v28_v6 = vlaneseq  ;;  %s114_s2 = smov [#allocation2]  }
   0x3   :  { %v15_v9 = vld [vmem:[%s147_s0] sm:$0xf]  ;;  %s71_s0 = sshll.u32 %s114_s2, 4  ;;  %s72_s0 = int_to_ptr.vmem [resolvable:$true] %s71_s0 }
   0x4   :  { %v29_v7 = vshrl.u32 %v28_v6, 7  ;;  %s88_s17 = scalar_lea.vmem %s72_s0, 128  ;;  %p93_p1 = scmp.lt.s32.totalorder %s72_s0, %s72_s0 }
   0x5   :  { %p89_p0 = scmp.ne.s32.totalorder %s72_s0, %s88_s17  ;;  %p94_p2 = scmp.lt.s32.totalorder %s88_s17, %s88_s17 }
   0x6   :  { %20 = vperm.xlu0 %84, %v17_v3   ;;  %86 = vset.pattern.permute.xlu1 %v112_v4  ;;  %v30_v8 = vsub.s32 0, %v29_v7  ;;  %v40_v10 = vsub.s32 1, %v29_v7  ;;  %v50_v11 = vsub.s32 2, %v29_v7  ;;  %v60_v17 = vsub.s32 3, %v29_v7 }
   0x7   :  { %45 = vperm.xlu1 %86, %v16_v0   ;;  %p95_p3 = por %p94_p2, %p93_p1 }
   0x8   :  { %v31_v12 = vrot.slane %v15_v9, %v30_v8  ;;  %v41_v15 = vrot.slane %v15_v9, %v40_v10  ;;  %v51_v16 = vrot.slane %v15_v9, %v50_v11  ;;  %v61_v24 = vrot.slane %v15_v9, %v60_v17 }
   0x9   :  { %p96_p4 = pnand %p95_p3, %p89_p0 }
   0xa   :  { %87 = vset.pattern.permute.xlu0 %v113_v5 }
   0xb   :  { %55 = vperm.xlu0 %87, %v16_v0  }
  0x7d   :  { %v26_v13 = vpop.permute.xlu0 %25  ;;  %v36_v14 = vpop.permute.xlu1 %35 }
  0x7e   :  { %v32_v18 = vmul.f32 %v31_v12, %v26_v13  ;;  %v42_v20 = vmul.f32 %v41_v15, %v36_v14 }
  0x81   :  { %v21_v19 = vpop.permute.xlu0 %20 }
  0x82   :  { %v33_v21 = vadd.f32 %v32_v18, %v21_v19  ;;  %v46_v22 = vpop.permute.xlu1 %45 }
  0x83   :  { %v52_v23 = vmul.f32 %v51_v16, %v46_v22 }
  0x84   :  { %v43_v25 = vadd.f32 %v42_v20, %v33_v21 }
  0x86   :  { %v53_v26 = vadd.f32 %v52_v23, %v43_v25  ;;  %v56_v27 = vpop.permute.xlu0 %55 }
  0x87   :  { %v62_v28 = vmul.f32 %v61_v24, %v56_v27 }
  0x89   :  { %v63_v29 = vadd.f32 %v62_v28, %v53_v26 }
  0x8b   :  { %64 = vst [vmem:[#allocation2] sm:$0xff] %v63_v29 }
  0x8c   :  { %99 = shalt.err (!%p96_p4)
}
  0x8d   :  { %74 = dma.vmem_to_hbm [thread:$0]  %s72_s0, 128, %s150_s3, [#allocation3]  }
  0x8e   :  { %108 = dma.done.wait [#allocation3], 128  }
  0x8f   :  { %109 = vsyncadd [#allocation3], 4294967168 }
  0x90   :  { %78 = vsyncpa [#allocation3], 1 }

</bundles_post_ra>
